<compile_context>
chip_gen: v6e
topology: v6e:2x2x1
jax: 0.10.0
libtpu: 0.0.40
codegen_flags: <defaults>
</compile_context>

<pallas_src>
import functools

import jax
import jax.numpy as jnp
from jax.experimental import pallas as pl
from jax.experimental.pallas import tpu as pltpu


# ----------------------------------------------------------------------------
# Pallas kernel: one (batch element, L-tile) per grid step.  Branch-free,
# no cross-step state -> both grid axes are independent ("parallel").
# ----------------------------------------------------------------------------
def _temporal_block_kernel(*refs, TL, P, k, dil, has_ds):
    if has_ds:
        (x_ref, halo_ref, w1_ref, b1_ref, w2_ref, b2_ref, wd_ref, bd_ref,
         o_ref, rhs1, rhs2) = refs
    else:
        (x_ref, halo_ref, w1_ref, b1_ref, w2_ref, b2_ref,
         o_ref, rhs1, rhs2) = refs
        wd_ref = bd_ref = None

    ci = x_ref.shape[0]          # padded input channels  (multiple of 8)
    co = o_ref.shape[0]          # padded output channels (multiple of 8)
    H = 2 * P                    # x halo width
    PT = P + TL                  # conv1 is evaluated on times [l*TL - P, l*TL + TL)

    x_tile = x_ref[...]          # (ci, TL)  x columns [l*TL, l*TL + TL)
    halo = halo_ref[...]         # (ci, 2P)  x columns [l*TL - 2P, l*TL), zeros for t < 0

    # ---- fused conv1: build stacked RHS (k*ci, P+TL), one matmul ----
    # Causal tap j reads x[t - P + j*dil]; over output times [l*TL - P, l*TL + TL)
    # that is columns [j*dil, j*dil + P + TL) of the conceptual [halo | x_tile]
    # window.  Each tap is copied exactly once (no xbuf staging copy).
    for j in range(k):
        off = j * dil
        n_h = H - off                                     # columns taken from the halo
        rhs1[j * ci:(j + 1) * ci, 0:n_h] = halo[:, off:H]
        rhs1[j * ci:(j + 1) * ci, n_h:PT] = x_tile[:, 0:PT - n_h]

    h = jnp.dot(w1_ref[...], rhs1[...], preferred_element_type=jnp.float32)
    h = jnp.maximum(h + b1_ref[...], 0.0)                 # (co, P+TL)
    # TODO(synk): nn.Dropout is identity in eval mode; training dropout not modeled.

    # conv2's left zero-padding: h at times < 0 must be 0 (only bites on the
    # first L-tile, where the P "recomputed" columns would otherwise be relu(b1)).
    t = jax.lax.broadcasted_iota(jnp.int32, (1, PT), 1) + (pl.program_id(1) * TL - P)
    h = jnp.where(t >= 0, h, 0.0)

    # ---- fused conv2: build stacked RHS (k*co, TL), one matmul ----
    for j in range(k):
        rhs2[j * co:(j + 1) * co, :] = h[:, j * dil:j * dil + TL]

    out = jnp.dot(w2_ref[...], rhs2[...], preferred_element_type=jnp.float32)
    out = jnp.maximum(out + b2_ref[...], 0.0)             # (co, TL)

    # ---- residual branch (1x1 conv iff channel counts differ) + final ReLU ----
    if has_ds:
        res = jnp.dot(wd_ref[...], x_tile,
                      preferred_element_type=jnp.float32) + bd_ref[...]
    else:
        res = x_tile
    o_ref[...] = jnp.maximum(out + res, 0.0).astype(o_ref.dtype)


# ----------------------------------------------------------------------------
# Generation-aware tiling / VMEM budgeting.
# ----------------------------------------------------------------------------
def _round_up(x, m):
    return ((x + m - 1) // m) * m


def _vmem_limit_bytes():
    cap = None
    try:
        cap = int(pltpu.get_tpu_info().vmem_capacity_bytes)
    except Exception:
        cap = None
    if not cap or cap <= 0:
        cap = 64 << 20                       # conservative (v7x-sized) fallback
    # ~56 MiB scoped limit on v7x (64 MiB physical), ~112 MiB on v5e/v6e (128 MiB).
    return min(cap - (8 << 20), 112 << 20)


def _est_vmem_bytes(ci, co, k, P, TL, has_ds):
    PT, H = P + TL, 2 * P
    blocks = 2 * (ci * TL + ci * H + co * TL)              # double-buffered x / halo / out
    weights = 2 * (co * k * ci + co * k * co + 2 * co)     # conservative: double-buffered
    if has_ds:
        weights += 2 * (co * ci + co)
    scratch = k * ci * PT + k * co * TL                    # stacked-RHS scratch
    values = co * PT + 3 * co * TL + ci * TL               # large value temporaries
    return 4 * (blocks + weights + scratch + values)


def _choose_l_tile(L, ci, co, k, P, has_ds, budget, max_tl=8192):
    """Largest multiple-of-128 tile (>= the 2P halo) that fits the VMEM budget."""
    min_tl = max(128, _round_up(2 * P, 128))
    cap = max(min_tl, min(max_tl, _round_up(max(L, 1), 128)))
    tl = min_tl
    t = min_tl
    while t <= cap:
        if _est_vmem_bytes(ci, co, k, P, t, has_ds) <= budget:
            tl = t
        t += 128
    return tl


# ----------------------------------------------------------------------------
# Host-side weight packing (tap fusion) with channel padding to multiples of 8.
# ----------------------------------------------------------------------------
def _pack_conv_weight(w_oik, ci_pad, co_pad):
    """PyTorch (C_out, C_in, k) -> (co_pad, k*ci_pad); tap j occupies columns
    [j*ci_pad, (j+1)*ci_pad).  Padding rows/columns are zero."""
    c_out, c_in, k = w_oik.shape
    w = jnp.zeros((co_pad, k, ci_pad), jnp.float32)
    w = w.at[:c_out, :, :c_in].set(jnp.transpose(w_oik.astype(jnp.float32), (0, 2, 1)))
    return w.reshape(co_pad, k * ci_pad)


def _pad_bias(b, co_pad):
    c_out = b.shape[0]
    return jnp.zeros((co_pad, 1), jnp.float32).at[:c_out, 0].set(b.astype(jnp.float32))


# ----------------------------------------------------------------------------
# Wrapper: NCL layout in / NCL layout out.
# ----------------------------------------------------------------------------
def temporal_block_pallas(x_ncl, w1_oik, b1, w2_oik, b2, wd_oik, bd, *,
                          kernel_size, dilation):
    """x_ncl: (N, C_in, L) float32 (PyTorch NCL layout).
    w1_oik: (C_out, C_in, k), w2_oik: (C_out, C_out, k) effective (weight-normed)
    conv weights; b1/b2: (C_out,).  wd_oik: (C_out, C_in, 1) or None; bd: (C_out,)
    or None.  stride=1 and padding=(k-1)*dilation assumed (standard TCN)."""
    N, c_in, L = x_ncl.shape
    c_out = w1_oik.shape[0]
    k, dil = kernel_size, dilation
    P = (k - 1) * dil
    assert P >= 1, "kernel_size == 1 (padding == 0) is not a valid TemporalBlock"
    has_ds = wd_oik is not None
    if not has_ds:
        assert c_in == c_out

    ci = _round_up(c_in, 8)
    co = _round_up(c_out, 8)
    H = 2 * P

    vmem_limit = _vmem_limit_bytes()
    budget = max(vmem_limit - (12 << 20), 8 << 20)
    TL = _choose_l_tile(L, ci, co, k, P, has_ds, budget)
    num_l = pl.cdiv(L, TL)
    L_r = num_l * TL

    f32 = jnp.float32
    # Channel-pad + right-pad x so every tile and every output store is full and
    # lane-dense (multiple of 128 lanes): no masked vst.msk anywhere.
    x_p = jnp.pad(x_ncl.astype(f32), ((0, 0), (0, ci - c_in), (0, L_r - L)))
    # Per-tile left halo source: columns [l*TL - 2P, l*TL), zeros for t < 0.
    x_halo = jnp.pad(x_ncl.astype(f32), ((0, 0), (0, ci - c_in), (H, L_r - L)))
    halos = (x_halo[:, :, :L_r]
             .reshape(N, ci, num_l, TL)[:, :, :, :H]
             .transpose(0, 2, 1, 3)
             .reshape(N * num_l, ci, H))

    w1p = _pack_conv_weight(w1_oik, ci, co)         # (co, k*ci)
    w2p = _pack_conv_weight(w2_oik, co, co)         # (co, k*co)
    b1p = _pad_bias(b1, co)
    b2p = _pad_bias(b2, co)

    in_specs = [
        pl.BlockSpec((pl.Squeezed(), ci, TL), lambda n, l: (n, 0, l)),
        pl.BlockSpec((pl.Squeezed(), ci, H), lambda n, l: (n * num_l + l, 0, 0)),
        pl.BlockSpec((co, k * ci), lambda n, l: (0, 0)),
        pl.BlockSpec((co, 1), lambda n, l: (0, 0)),
        pl.BlockSpec((co, k * co), lambda n, l: (0, 0)),
        pl.BlockSpec((co, 1), lambda n, l: (0, 0)),
    ]
    inputs = [x_p, halos, w1p, b1p, w2p, b2p]
    if has_ds:
        wdp = jnp.zeros((co, ci), f32).at[:c_out, :c_in].set(
            wd_oik[:, :, 0].astype(f32))
        bdp = _pad_bias(bd, co)
        in_specs += [pl.BlockSpec((co, ci), lambda n, l: (0, 0)),
                     pl.BlockSpec((co, 1), lambda n, l: (0, 0))]
        inputs += [wdp, bdp]

    kernel = functools.partial(_temporal_block_kernel, TL=TL, P=P, k=k, dil=dil,
                               has_ds=has_ds)

    out = pl.pallas_call(
        kernel,
        out_shape=jax.ShapeDtypeStruct((N, co, L_r), f32),
        grid_spec=pltpu.PrefetchScalarGridSpec(
            num_scalar_prefetch=0,
            grid=(N, num_l),
            in_specs=in_specs,
            out_specs=pl.BlockSpec((pl.Squeezed(), co, TL), lambda n, l: (n, 0, l)),
            scratch_shapes=[
                pltpu.VMEM((k * ci, P + TL), f32),   # stacked RHS for conv1
                pltpu.VMEM((k * co, TL), f32),       # stacked RHS for conv2
            ],
        ),
        compiler_params=pltpu.CompilerParams(
            # No cross-tile state (halo-recompute variant): both axes are truly
            # independent, so both TensorCores on v7x get work even for N == 1.
            dimension_semantics=("parallel", "parallel"),
            vmem_limit_bytes=int(vmem_limit)),
    )(*inputs)

    return out[:, :c_out, :L]


# ----------------------------------------------------------------------------
# Parameter setup (deterministic, synthetic) + weight_norm reparameterization.
# PyTorch weight_norm(dim=0): w[o] = g[o] * v[o] / ||v[o]||_2
# ----------------------------------------------------------------------------
def _weight_norm_effective(v_oik, g_o):
    norm = jnp.sqrt(jnp.sum(v_oik * v_oik, axis=(1, 2), keepdims=True))
    return g_o[:, None, None] * v_oik / norm


def make_params(key, c_in, c_out, k):
    ks = jax.random.split(key, 8)
    v1 = 0.01 * jax.random.normal(ks[0], (c_out, c_in, k), jnp.float32)
    g1 = 0.5 + jax.random.uniform(ks[1], (c_out,), jnp.float32)
    b1 = 0.01 * jax.random.normal(ks[2], (c_out,), jnp.float32)
    v2 = 0.01 * jax.random.normal(ks[3], (c_out, c_out, k), jnp.float32)
    g2 = 0.5 + jax.random.uniform(ks[4], (c_out,), jnp.float32)
    b2 = 0.01 * jax.random.normal(ks[5], (c_out,), jnp.float32)
    w1_oik = _weight_norm_effective(v1, g1)
    w2_oik = _weight_norm_effective(v2, g2)
    if c_in != c_out:
        wd_oik = 0.01 * jax.random.normal(ks[6], (c_out, c_in, 1), jnp.float32)
        bd = 0.01 * jax.random.normal(ks[7], (c_out,), jnp.float32)
    else:
        wd_oik, bd = None, None
    return w1_oik, b1, w2_oik, b2, wd_oik, bd


# ----------------------------------------------------------------------------
# Pure-JAX reference mirroring the PyTorch forward (NCL layout), for validation.
# ----------------------------------------------------------------------------
def _conv1d_torch_like(x_ncl, w_oik, b, pad, dil):
    y = jax.lax.conv_general_dilated(
        x_ncl, w_oik, window_strides=(1,), padding=[(pad, pad)],
        rhs_dilation=(dil,), dimension_numbers=("NCH", "OIH", "NCH"))
    return y + b[None, :, None]


def temporal_block_reference(x_ncl, w1_oik, b1, w2_oik, b2, wd_oik, bd, *, k, dil):
    L = x_ncl.shape[-1]
    pad = (k - 1) * dil
    h = _conv1d_torch_like(x_ncl, w1_oik, b1, pad, dil)[:, :, :L]   # Chomp1d
    h = jnp.maximum(h, 0.0)
    h2 = _conv1d_torch_like(h, w2_oik, b2, pad, dil)[:, :, :L]      # Chomp1d
    h2 = jnp.maximum(h2, 0.0)
    if wd_oik is None:
        res = x_ncl
    else:
        res = _conv1d_torch_like(x_ncl, wd_oik, bd, 0, 1)
    return jnp.maximum(h2 + res, 0.0)


if __name__ == "__main__":
    # Small shapes implied by the module: Conv1d input is (N, C_in, L).
    N, C_IN, C_OUT, L = 2, 4, 8, 16
    K, DIL = 3, 2   # stride=1, padding=(K-1)*DIL assumed (standard TCN)

    key = jax.random.PRNGKey(0)
    kx, kp = jax.random.split(key)
    x_ncl = jax.random.normal(kx, (N, C_IN, L), jnp.float32)

    w1_oik, b1, w2_oik, b2, wd_oik, bd = make_params(kp, C_IN, C_OUT, K)

    out_ncl = temporal_block_pallas(
        x_ncl, w1_oik, b1, w2_oik, b2, wd_oik, bd,
        kernel_size=K, dilation=DIL)
    out_ncl = jax.block_until_ready(out_ncl)

    ref_ncl = temporal_block_reference(
        x_ncl, w1_oik, b1, w2_oik, b2, wd_oik, bd, k=K, dil=DIL)

    assert out_ncl.shape == (N, C_OUT, L)
    assert jnp.allclose(out_ncl, ref_ncl, atol=5e-5, rtol=5e-5), (
        "mismatch vs reference")
    print("KERNEL_OK")
</pallas_src>

<mosaic_0001>
module attributes {stable_mosaic.version = 11 : i64} {
  func.func @_temporal_block_kernel(%arg0: i32, %arg1: i32, %arg2: memref<1x8x128xf32, #tpu.memory_space<vmem>>, %arg3: memref<1x8x8xf32, #tpu.memory_space<vmem>>, %arg4: memref<8x24xf32, #tpu.memory_space<vmem>>, %arg5: memref<8x1xf32, #tpu.memory_space<vmem>>, %arg6: memref<8x24xf32, #tpu.memory_space<vmem>>, %arg7: memref<8x1xf32, #tpu.memory_space<vmem>>, %arg8: memref<8x8xf32, #tpu.memory_space<vmem>>, %arg9: memref<8x1xf32, #tpu.memory_space<vmem>>, %arg10: memref<1x8x128xf32, #tpu.memory_space<vmem>>, %arg11: memref<24x132xf32, #tpu.memory_space<vmem>>, %arg12: memref<24x128xf32, #tpu.memory_space<vmem>>) attributes {dimension_semantics = [#tpu.dimension_semantics<parallel>, #tpu.dimension_semantics<parallel>], iteration_bounds = array<i64: 2, 1>, scalar_prefetch = 0 : i64, scratch_operands = 2 : i64, tpu.core_type = #tpu.core_type<tc>, window_params = [{transform_indices = @transform_0, window_bounds = array<i64: 1, 8, 128>}, {transform_indices = @transform_1, window_bounds = array<i64: 1, 8, 8>}, {pipeline_mode = #tpu.pipeline_mode<synchronous>, transform_indices = @transform_2, window_bounds = array<i64: 8, 24>}, {pipeline_mode = #tpu.pipeline_mode<synchronous>, transform_indices = @transform_3, window_bounds = array<i64: 8, 1>}, {pipeline_mode = #tpu.pipeline_mode<synchronous>, transform_indices = @transform_4, window_bounds = array<i64: 8, 24>}, {pipeline_mode = #tpu.pipeline_mode<synchronous>, transform_indices = @transform_5, window_bounds = array<i64: 8, 1>}, {pipeline_mode = #tpu.pipeline_mode<synchronous>, transform_indices = @transform_6, window_bounds = array<i64: 8, 8>}, {pipeline_mode = #tpu.pipeline_mode<synchronous>, transform_indices = @transform_7, window_bounds = array<i64: 8, 1>}, {transform_indices = @transform_8, window_bounds = array<i64: 1, 8, 128>}]} {
    %c0 = arith.constant 0 : index
    %c0_0 = arith.constant 0 : index
    %c0_1 = arith.constant 0 : index
    %0 = vector.load %arg2[%c0, %c0_0, %c0_1] : memref<1x8x128xf32, #tpu.memory_space<vmem>>, vector<1x8x128xf32>
    %1 = vector.shape_cast %0 : vector<1x8x128xf32> to vector<8x128xf32>
    %c0_2 = arith.constant 0 : index
    %c0_3 = arith.constant 0 : index
    %c0_4 = arith.constant 0 : index
    %2 = vector.load %arg3[%c0_2, %c0_3, %c0_4] : memref<1x8x8xf32, #tpu.memory_space<vmem>>, vector<1x8x8xf32>
    %3 = vector.shape_cast %2 : vector<1x8x8xf32> to vector<8x8xf32>
    %c0_5 = arith.constant 0 : index
    %c0_6 = arith.constant 0 : index
    %4 = vector.load %arg11[%c0_5, %c0_6] : memref<24x132xf32, #tpu.memory_space<vmem>>, vector<8x8xf32>
    tpu.vector_store %arg11[%c0_5, %c0_6], %3 {strides = array<i32>} : memref<24x132xf32, #tpu.memory_space<vmem>>, vector<8x8xf32>,
    %5 = vector.extract_strided_slice %1 {offsets = [0, 0], sizes = [8, 124], strides = [1, 1]} : vector<8x128xf32> to vector<8x124xf32>
    %c0_7 = arith.constant 0 : index
    %c8 = arith.constant 8 : index
    %6 = vector.load %arg11[%c0_7, %c8] : memref<24x132xf32, #tpu.memory_space<vmem>>, vector<8x124xf32>
    tpu.vector_store %arg11[%c0_7, %c8], %5 {strides = array<i32>} : memref<24x132xf32, #tpu.memory_space<vmem>>, vector<8x124xf32>,
    %7 = vector.extract_strided_slice %3 {offsets = [0, 2], sizes = [8, 6], strides = [1, 1]} : vector<8x8xf32> to vector<8x6xf32>
    %c8_8 = arith.constant 8 : index
    %c0_9 = arith.constant 0 : index
    %8 = vector.load %arg11[%c8_8, %c0_9] : memref<24x132xf32, #tpu.memory_space<vmem>>, vector<8x6xf32>
    tpu.vector_store %arg11[%c8_8, %c0_9], %7 {strides = array<i32>} : memref<24x132xf32, #tpu.memory_space<vmem>>, vector<8x6xf32>,
    %9 = vector.extract_strided_slice %1 {offsets = [0, 0], sizes = [8, 126], strides = [1, 1]} : vector<8x128xf32> to vector<8x126xf32>
    %c8_10 = arith.constant 8 : index
    %c6 = arith.constant 6 : index
    %10 = vector.load %arg11[%c8_10, %c6] : memref<24x132xf32, #tpu.memory_space<vmem>>, vector<8x126xf32>
    tpu.vector_store %arg11[%c8_10, %c6], %9 {strides = array<i32>} : memref<24x132xf32, #tpu.memory_space<vmem>>, vector<8x126xf32>,
    %11 = vector.extract_strided_slice %3 {offsets = [0, 4], sizes = [8, 4], strides = [1, 1]} : vector<8x8xf32> to vector<8x4xf32>
    %c16 = arith.constant 16 : index
    %c0_11 = arith.constant 0 : index
    %12 = vector.load %arg11[%c16, %c0_11] : memref<24x132xf32, #tpu.memory_space<vmem>>, vector<8x4xf32>
    tpu.vector_store %arg11[%c16, %c0_11], %11 {strides = array<i32>} : memref<24x132xf32, #tpu.memory_space<vmem>>, vector<8x4xf32>,
    %c16_12 = arith.constant 16 : index
    %c4 = arith.constant 4 : index
    %13 = vector.load %arg11[%c16_12, %c4] : memref<24x132xf32, #tpu.memory_space<vmem>>, vector<8x128xf32>
    tpu.vector_store %arg11[%c16_12, %c4], %1 {strides = array<i32>} : memref<24x132xf32, #tpu.memory_space<vmem>>, vector<8x128xf32>,
    %c0_13 = arith.constant 0 : index
    %c0_14 = arith.constant 0 : index
    %14 = vector.load %arg4[%c0_13, %c0_14] : memref<8x24xf32, #tpu.memory_space<vmem>>, vector<8x24xf32>
    %c0_15 = arith.constant 0 : index
    %c0_16 = arith.constant 0 : index
    %15 = vector.load %arg11[%c0_15, %c0_16] : memref<24x132xf32, #tpu.memory_space<vmem>>, vector<24x132xf32>
    %cst = arith.constant dense<0.000000e+00> : vector<8x132xf32>
    %16 = tpu.matmul %14, %15, %cst {dimension_numbers = #tpu.dot_dimension_numbers<[1], [0], [0], [1], [0, 0, 1, 1], [], []>} : vector<8x24xf32>, vector<24x132xf32>, vector<8x132xf32> -> vector<8x132xf32>
    %c0_17 = arith.constant 0 : index
    %c0_18 = arith.constant 0 : index
    %17 = vector.load %arg5[%c0_17, %c0_18] : memref<8x1xf32, #tpu.memory_space<vmem>>, vector<8x1xf32>
    %18 = vector.broadcast %17 : vector<8x1xf32> to vector<8x132xf32>
    %19 = arith.addf %16, %18 : vector<8x132xf32>
    %cst_19 = arith.constant 0.000000e+00 : f32
    %20 = vector.broadcast %cst_19 : f32 to vector<8x132xf32>
    %21 = arith.maximumf %19, %20 : vector<8x132xf32>
    %22 = tpu.iota {dimensions = array<i32: 1>} : vector<1x132xi32>
    %c128_i32 = arith.constant 128 : i32
    %23 = arith.muli %arg1, %c128_i32 : i32
    %c4_i32 = arith.constant 4 : i32
    %24 = arith.subi %23, %c4_i32 : i32
    %25 = vector.broadcast %24 : i32 to vector<1x132xi32>
    %26 = arith.addi %22, %25 : vector<1x132xi32>
    %c0_i32 = arith.constant 0 : i32
    %27 = vector.broadcast %c0_i32 : i32 to vector<1x132xi32>
    %28 = arith.cmpi sge, %26, %27 : vector<1x132xi32>
    %cst_20 = arith.constant 0.000000e+00 : f32
    %29 = vector.shape_cast %28 : vector<1x132xi1> to vector<1x132xi1>
    %30 = vector.broadcast %29 : vector<1x132xi1> to vector<8x132xi1>
    %31 = vector.broadcast %cst_20 : f32 to vector<8x132xf32>
    %32 = arith.select %30, %21, %31 : vector<8x132xi1>, vector<8x132xf32>
    %33 = vector.extract_strided_slice %32 {offsets = [0, 0], sizes = [8, 128], strides = [1, 1]} : vector<8x132xf32> to vector<8x128xf32>
    %c0_21 = arith.constant 0 : index
    %c0_22 = arith.constant 0 : index
    %34 = vector.load %arg12[%c0_21, %c0_22] : memref<24x128xf32, #tpu.memory_space<vmem>>, vector<8x128xf32>
    tpu.vector_store %arg12[%c0_21, %c0_22], %33 {strides = array<i32>} : memref<24x128xf32, #tpu.memory_space<vmem>>, vector<8x128xf32>,
    %35 = vector.extract_strided_slice %32 {offsets = [0, 2], sizes = [8, 128], strides = [1, 1]} : vector<8x132xf32> to vector<8x128xf32>
    %c8_23 = arith.constant 8 : index
    %c0_24 = arith.constant 0 : index
    %36 = vector.load %arg12[%c8_23, %c0_24] : memref<24x128xf32, #tpu.memory_space<vmem>>, vector<8x128xf32>
    tpu.vector_store %arg12[%c8_23, %c0_24], %35 {strides = array<i32>} : memref<24x128xf32, #tpu.memory_space<vmem>>, vector<8x128xf32>,
    %37 = vector.extract_strided_slice %32 {offsets = [0, 4], sizes = [8, 128], strides = [1, 1]} : vector<8x132xf32> to vector<8x128xf32>
    %c16_25 = arith.constant 16 : index
    %c0_26 = arith.constant 0 : index
    %38 = vector.load %arg12[%c16_25, %c0_26] : memref<24x128xf32, #tpu.memory_space<vmem>>, vector<8x128xf32>
    tpu.vector_store %arg12[%c16_25, %c0_26], %37 {strides = array<i32>} : memref<24x128xf32, #tpu.memory_space<vmem>>, vector<8x128xf32>,
    %c0_27 = arith.constant 0 : index
    %c0_28 = arith.constant 0 : index
    %39 = vector.load %arg6[%c0_27, %c0_28] : memref<8x24xf32, #tpu.memory_space<vmem>>, vector<8x24xf32>
    %c0_29 = arith.constant 0 : index
    %c0_30 = arith.constant 0 : index
    %40 = vector.load %arg12[%c0_29, %c0_30] : memref<24x128xf32, #tpu.memory_space<vmem>>, vector<24x128xf32>
    %cst_31 = arith.constant dense<0.000000e+00> : vector<8x128xf32>
    %41 = tpu.matmul %39, %40, %cst_31 {dimension_numbers = #tpu.dot_dimension_numbers<[1], [0], [0], [1], [0, 0, 1, 1], [], []>} : vector<8x24xf32>, vector<24x128xf32>, vector<8x128xf32> -> vector<8x128xf32>
    %c0_32 = arith.constant 0 : index
    %c0_33 = arith.constant 0 : index
    %42 = vector.load %arg7[%c0_32, %c0_33] : memref<8x1xf32, #tpu.memory_space<vmem>>, vector<8x1xf32>
    %43 = vector.broadcast %42 : vector<8x1xf32> to vector<8x128xf32>
    %44 = arith.addf %41, %43 : vector<8x128xf32>
    %cst_34 = arith.constant 0.000000e+00 : f32
    %45 = vector.broadcast %cst_34 : f32 to vector<8x128xf32>
    %46 = arith.maximumf %44, %45 : vector<8x128xf32>
    %c0_35 = arith.constant 0 : index
    %c0_36 = arith.constant 0 : index
    %47 = vector.load %arg8[%c0_35, %c0_36] : memref<8x8xf32, #tpu.memory_space<vmem>>, vector<8x8xf32>
    %cst_37 = arith.constant dense<0.000000e+00> : vector<8x128xf32>
    %48 = tpu.matmul %47, %1, %cst_37 {dimension_numbers = #tpu.dot_dimension_numbers<[1], [0], [0], [1], [0, 0, 1, 1], [], []>} : vector<8x8xf32>, vector<8x128xf32>, vector<8x128xf32> -> vector<8x128xf32>
    %c0_38 = arith.constant 0 : index
    %c0_39 = arith.constant 0 : index
    %49 = vector.load %arg9[%c0_38, %c0_39] : memref<8x1xf32, #tpu.memory_space<vmem>>, vector<8x1xf32>
    %50 = vector.broadcast %49 : vector<8x1xf32> to vector<8x128xf32>
    %51 = arith.addf %48, %50 : vector<8x128xf32>
    %52 = arith.addf %46, %51 : vector<8x128xf32>
    %cst_40 = arith.constant 0.000000e+00 : f32
    %53 = vector.broadcast %cst_40 : f32 to vector<8x128xf32>
    %54 = arith.maximumf %52, %53 : vector<8x128xf32>
    %c0_41 = arith.constant 0 : index
    %c0_42 = arith.constant 0 : index
    %c0_43 = arith.constant 0 : index
    %55 = vector.load %arg10[%c0_41, %c0_42, %c0_43] : memref<1x8x128xf32, #tpu.memory_space<vmem>>, vector<1x8x128xf32>
    %56 = vector.shape_cast %55 : vector<1x8x128xf32> to vector<8x128xf32>
    %57 = vector.shape_cast %54 : vector<8x128xf32> to vector<1x8x128xf32>
    tpu.vector_store %arg10[%c0_41, %c0_42, %c0_43], %57 {strides = array<i32>} : memref<1x8x128xf32, #tpu.memory_space<vmem>>, vector<1x8x128xf32>,
    return
  }
  func.func @transform_0(%arg0: i32, %arg1: i32) -> (i32, i32, i32) {
    %c0_i32 = arith.constant 0 : i32
    %c0_i32_0 = arith.constant 0 : i32
    return %arg0, %c0_i32, %arg1 : i32, i32, i32
  }
  func.func @transform_1(%arg0: i32, %arg1: i32) -> (i32, i32, i32) {
    %c1_i32 = arith.constant 1 : i32
    %0 = arith.muli %arg0, %c1_i32 : i32
    %1 = arith.addi %0, %arg1 : i32
    %c0_i32 = arith.constant 0 : i32
    %c0_i32_0 = arith.constant 0 : i32
    %c0_i32_1 = arith.constant 0 : i32
    return %1, %c0_i32, %c0_i32_0 : i32, i32, i32
  }
  func.func @transform_2(%arg0: i32, %arg1: i32) -> (i32, i32) {
    %c0_i32 = arith.constant 0 : i32
    %c0_i32_0 = arith.constant 0 : i32
    %c0_i32_1 = arith.constant 0 : i32
    return %c0_i32, %c0_i32_0 : i32, i32
  }
  func.func @transform_3(%arg0: i32, %arg1: i32) -> (i32, i32) {
    %c0_i32 = arith.constant 0 : i32
    %c0_i32_0 = arith.constant 0 : i32
    %c0_i32_1 = arith.constant 0 : i32
    return %c0_i32, %c0_i32_0 : i32, i32
  }
  func.func @transform_4(%arg0: i32, %arg1: i32) -> (i32, i32) {
    %c0_i32 = arith.constant 0 : i32
    %c0_i32_0 = arith.constant 0 : i32
    %c0_i32_1 = arith.constant 0 : i32
    return %c0_i32, %c0_i32_0 : i32, i32
  }
  func.func @transform_5(%arg0: i32, %arg1: i32) -> (i32, i32) {
    %c0_i32 = arith.constant 0 : i32
    %c0_i32_0 = arith.constant 0 : i32
    %c0_i32_1 = arith.constant 0 : i32
    return %c0_i32, %c0_i32_0 : i32, i32
  }
  func.func @transform_6(%arg0: i32, %arg1: i32) -> (i32, i32) {
    %c0_i32 = arith.constant 0 : i32
    %c0_i32_0 = arith.constant 0 : i32
    %c0_i32_1 = arith.constant 0 : i32
    return %c0_i32, %c0_i32_0 : i32, i32
  }
  func.func @transform_7(%arg0: i32, %arg1: i32) -> (i32, i32) {
    %c0_i32 = arith.constant 0 : i32
    %c0_i32_0 = arith.constant 0 : i32
    %c0_i32_1 = arith.constant 0 : i32
    return %c0_i32, %c0_i32_0 : i32, i32
  }
  func.func @transform_8(%arg0: i32, %arg1: i32) -> (i32, i32, i32) {
    %c0_i32 = arith.constant 0 : i32
    %c0_i32_0 = arith.constant 0 : i32
    return %arg0, %c0_i32, %arg1 : i32, i32, i32
  }
}

</mosaic_0001>

<bundles_post_ra>
// kernel: tpu_custom_call.1
= control target key start
LH: loop header
LB: loop body
LE: loop exit
PB: predicated region body
PF: predicated region fallthrough
CT: control target
= control target key end

     0   :  { %s1355_s0 = inlined_call_operand.vmem [shape: f32[2,8,128], index: 0, kind: input, shape index: {}]   ;;  %s1356_s1 = inlined_call_operand.hbm [shape: f32[2,8,8], index: 1, kind: input, shape index: {}]   ;;  %s1357_s2 = inlined_call_operand.vmem [shape: f32[8,24], index: 2, kind: input, shape index: {}]   ;;  %s1358_s3 = inlined_call_operand.vmem [shape: f32[8,1], index: 3, kind: input, shape index: {}]   ;;  %s1359_s4 = inlined_call_operand.vmem [shape: f32[8,24], index: 4, kind: input, shape index: {}]   ;;  %s1360_s5 = inlined_call_operand.vmem [shape: f32[8,1], index: 5, kind: input, shape index: {}]   ;;  %s1361_s6 = inlined_call_operand.hbm [shape: f32[8,8], index: 6, kind: input, shape index: {}]   ;;  %s1362_s7 = inlined_call_operand.vmem [shape: f32[8,1], index: 7, kind: input, shape index: {}]   ;;  %s1363_s8 = inlined_call_operand.hbm [shape: f32[2,8,128], index: 8, kind: output, shape index: {}]  }
   0x1   :  { %1368 = sst [smem:[#allocation16_spill]] %s1361_s6 }
   0x2   :  { %13 = vsyncpa [#allocation5], 0 }
   0x3   :  { %15 = vsyncpa [#allocation5 + $0x1], 0 }
   0x4   :  { %16 = vsyncpa [#allocation8], 0 }
   0x5   :  { %17 = vsyncpa [#allocation6], 0 }
   0x6   :  { %19 = vsyncpa [#allocation6 + $0x1], 0  ;;  %s1145_s27 = smov 0   ;;  %s1147_s28 = smov 0  }
   0x7   :  { %s1149_s29 = smov 0   ;;  %s1151_s30 = smov 0  }
   0x8   :  { %s1153_s9 = smov 0   ;;  %s1155_s10 = smov 0  }
   0x9 LB: > { %1369 = sst [smem:[#allocation13_spill]] %s1083_s9  ;;  %s826_s11 = sadd.s32 4294967295, %s1087_s10   ;;  %s1087_s10 = sphi %s1155_s10, %s25_s10   ;;  %s1083_s9 = sphi %s1153_s9, %s1386_s9   ;;  %s1079_s30 = sphi %s1151_s30, %s1385_s30   ;;  %s1075_s29 = sphi %s1149_s29, %s1389_s29   ;;  %s1071_s28 = sphi %s1147_s28, %s1388_s28   ;;  %s1067_s27 = sphi %s1145_s27, %s1387_s27  }
   0xa   : > { %s827_s12 = sadd.s32 4294967294, %s1087_s10   ;;  %p87_p0 = scmp.ne.s32.totalorder %s1071_s28, %s1067_s27 }
   0xb   : > { %p1179_p1 = scmp.eq.s32.totalorder %s826_s11, 0  ;;  %p1183_p2 = scmp.eq.s32.totalorder %s826_s11, 1 }
   0xc   : > { %p245_p3 = scmp.eq.s32.totalorder %s827_s12, 1  ;;  %p828_p5 = scmp.ge.s32.totalorder %s1087_s10, 1 }
   0xd   : > { %p1189_p4 = por %p1179_p1, %p87_p0  ;;  %p252_p7 = scmp.lt.s32.totalorder %s1087_s10, 3 }
   0xe   : > { %p1194_p6 = por %p245_p3, %p87_p0  ;;  %s1089_s18 = smov [#allocation7]  }
   0xf   : > { %s1372_s15 = scalar_select %p1189_p4, 1, 0 }
  0x10   : > { %s1373_s16 = scalar_select %p1194_p6, 1, 0 }
  0x11   : > { %p1199_p8 = pnand %p828_p5, %p252_p7  ;;  %s277_s19 = sshll.u32 %s1089_s18, 4  ;;  %s278_s19 = int_to_ptr.vmem [resolvable:$true] %s277_s19 }
  0x12   : > { %1374 = sst [smem:[#allocation14_spill]] %s1373_s16  ;;  %s37_s21 = sadd.s32 1, %s1083_s9 }
  0x13   : > { %p874_p10 = pneg %p1199_p8  ;;  %s74_s22 = sadd.s32 1, %s1075_s29 }
  0x14   : > { %p39_p12 = scmp.ge.s32.totalorder %s37_s21, 2  ;;  %s960_s23 = scalar_lea.vmem %s278_s19, 128 }
  0x15   : > { %p1208_p11 = pnand %p874_p10, %p1179_p1  ;;  %p961_p0 = scmp.ne.s32.totalorder %s278_s19, %s960_s23 }
  0x16   : > { %p968_p7 = scmp.lt.s32.totalorder %s278_s19, %s278_s19  ;;  %p969_p6 = scmp.lt.s32.totalorder %s960_s23, %s960_s23 }
  0x17   : > { %p951_p13 = pneg %p1208_p11 }
  0x18   : > { %p970_p9 = por %p969_p6, %p968_p7 }
  0x19   : > { %p963_p3 = pnand %p961_p0, %p951_p13 }
  0x1b   : > { %p964_p5 = pneg %p963_p3 }
  0x1d   : > { %p971_p4 = pnand %p970_p9, %p964_p5 }
  0x1f   : > { %974 = shalt.err (!%p971_p4)
}
  0x20   : > { %s1377_s6 = sld [smem:[#allocation16_spill]]  ;;  %s1391_s21 = smov (%p39_p12, %s37_s21), 0 }
  0x21   : > { %1378 = sst [smem:[#allocation15_spill]] %s1391_s21  ;;  %p81_p6 = scmp.ne.s32.totalorder %s1075_s29, %s1071_s28 }
  0x22   : > { %p82_p4 = scmp.eq.s32.totalorder %s1087_s10, 0  ;;  %s71_s26 = ssub.s32 %s1083_s9, %s1391_s21 }
  0x23   : > { %p887_p9 = scmp.lt.s32.totalorder %s1087_s10, 2  ;;  %p72_p10 = scmp.eq.s32.totalorder %s71_s26, 0 }
  0x24   : > { %p83_p13 = por %p82_p4, %p81_p6  ;;  %p1231_p0 = por %p1183_p2, %p81_p6 }
  0x25   : > { %s301_s12 = sand.u32 1, %s1075_s29   ;;  %s832_s23 = sshll.u32 %s1083_s9, 7 }
  0x26   : > { %877 = dma.hbm_to_vmem [thread:$0]  (!%p1208_p11), %s1377_s6, 128, %s278_s19, [#allocation8]  }
  0x27   : > { %s1237_s18 = scalar_select %p72_p10, %s1075_s29, %s74_s22  }
  0x28   : > { %s831_s20 = sshll.u32 %s301_s12, 3  ;;  %s311_s25 = scalar_lea.hbm %s1356_s1, %s832_s23 }
  0x29   : > { %s305_s6 = scalar_lea.vmem [#allocation4], %s831_s20  ;;  %p1243_p11 = pnand %p887_p9, %p83_p13 }
  0x2a   : > { %s313_s16 = sshll.u32 %s305_s6, 4  ;;  %s302_s14 = scalar_lea.sflag [#allocation5], %s301_s12  ;;  %s314_s16 = int_to_ptr.vmem [resolvable:$true] %s313_s16 }
  0x2b   : > { %p977_p2 = pneg %p1243_p11  ;;  %s988_s21 = scalar_lea.vmem %s314_s16, 128 }
  0x2c   : > { %p989_p12 = scmp.ne.s32.totalorder %s314_s16, %s988_s21  ;;  %s1090_s22 = smov [#allocation4]  }
  0x2d   : > { %s993_s9 = sshll.u32 %s1090_s22, 4  ;;  %s994_s9 = int_to_ptr.vmem [resolvable:$false] %s993_s9 }
  0x2e   : > { %p991_p3 = pnand %p989_p12, %p977_p2  ;;  %s995_s19 = scalar_lea.vmem %s994_s9, 256 }
  0x2f   : > { %p996_p7 = scmp.lt.s32.totalorder %s314_s16, %s994_s9  ;;  %p997_p6 = scmp.lt.s32.totalorder %s995_s19, %s988_s21 }
  0x30   : > { %p992_p5 = pneg %p991_p3 }
  0x31   : > { %p998_p4 = por %p997_p6, %p996_p7 }
  0x33   : > { %p999_p10 = pnand %p998_p4, %p992_p5 }
  0x35   : > { %1002 = shalt.err (!%p999_p10)
}
  0x36   : > { %881 = dma.hbm_to_vmem [thread:$0]  (!%p1243_p11), %s311_s25, 128, %s314_s16, %s302_s14  }
  0x37   : > { %322 = sbr.rel (%p1199_p8) target bundleno = 736 (0x2e0), region = 52  ;;  %s1254_s6 = sand.u32 (!%p1199_p8), 1, %s1071_s28  }
  0x38   : > { %s834_s12 = sshll.u32 (!%p1199_p8), %s1254_s6, 3  ;;  %s325_s20 = scalar_lea.sflag (!%p1199_p8), [#allocation5], %s1254_s6 }
  0x39   : > { %s328_s9 = scalar_lea.vmem (!%p1199_p8), [#allocation4], %s834_s12  ;;  %p1381_p9 = scmp.ne.s32.totalorder (!%p1199_p8), %s1372_s15, 0 }
  0x3c   : > { %1054 = dma.done.wait (%p1381_p9), %s325_s20, 128  }
  0x3d   : > { %1056 = vsyncadd (%p1381_p9), %s325_s20, 4294967168 }
  0x3e   : > { %1058 = dma.done.wait (%p1179_p1), [#allocation8], 128  }
  0x3f   : > { %1060 = vsyncadd (%p1179_p1), [#allocation8], 4294967168  ;;  %p372_p8 = scmp.lt.s32.totalorder %s1079_s30, 1  ;;  %vm382_vm0 = vcmask 64512   ;;  %v381_v0 = vld [vmem:[%s328_s9] sm:$0xff]  ;;  %s1091_s25 = smov 124   ;;  %v504_v18 = vlaneseq }
  0x40   : > { %404 = vrot.lane.b32.xlu0 %v381_v0, %s1091_s25  ;;  %383 = vst.msk [vmem:[#allocation2] sm:$0xff] %vm382_vm0, %v381_v0  ;;  %s1092_s15 = smov 126   ;;  %s1093_s13 = smov 4   ;;  %v1095_v2 = vmov 0.0   ;;  %v421_v3 = vld [vmem:[%s1358_s3] sm:$0xff]  ;;  %v1096_v4 = vmov 0  }
  0x41   : > { %s373_s16 = scalar_select %p372_p8, %s1079_s30, 1  ;;  %393 = vrot.lane.b32.xlu1 %v381_v0, %s1092_s15  ;;  %495 = vmatprep.mubr.f32.mxu0 %v1095_v2  ;;  %vm1097_vm1 = vmmov 0   ;;  %vm390_vm2 = vcmask 31744   ;;  %vm396_vm3 = vcmask 48128   ;;  %vm411_vm4 = vcmask 1047584   ;;  %v414_v16 = vld [vmem:[%s1357_s2] sm:$0xff] }
  0x42   : > { %s1094_s26 = smov 6   ;;  %852 = vmatprep.subr.mxu1 %v1095_v2  ;;  %947 = vset.pattern.permute.xlu1 %v1096_v4  ;;  %s1098_s19 = smov 8   ;;  %vm401_vm5 = vcmask 1047600   ;;  %vm388_vm6 = vcmask 1047616   ;;  %vm427_vm7 = vcmask 195584   ;;  %v623_v17 = vld [vmem:[#allocation7] sm:$0xff] }
  0x43   : > { %s837_s17 = sshll.u32 %s373_s16, 3  ;;  %948 = vset.pattern.permute.xlu0 %v1096_v4  ;;  %858 = vmatprep.mubr.msk.f32.mxu1 %vm1097_vm1, %v1095_v2  ;;  %v505_v19 = vand.u32 127, %v504_v18  ;;  %v543_v31 = vld [vmem:[%s1360_s5] sm:$0xff]  ;;  %vm535_vm9 = vcmask 1014784   ;;  %vm527_vm10 = vcmask 1031168   ;;  %s707_s20 = scalar_lea.sflag [#allocation6], %s1254_s6 }
  0x44   : > { %s378_s24 = scalar_lea.vmem %s1355_s0, %s837_s17  ;;  %v624_v32 = vld [vmem:[%s1362_s7] sm:$0xff]  ;;  %s1099_s16 = smov [#allocation9]  }
  0x45   : > { %v380_v1 = vld [vmem:[%s378_s24] sm:$0xff]  ;;  %v510_v21 = vadd.s32 4294967292, %v505_v19  ;;  %s1007_s17 = sshll.u32 %s1099_s16, 4  ;;  %s1008_s17 = int_to_ptr.vmem [resolvable:$false] %s1007_s17 }
  0x46   : > { %408 = vrot.lane.b32.xlu0 %v380_v1, %s1093_s13  ;;  %398 = vrot.lane.b32.xlu1 %v380_v1, %s1094_s26  ;;  %v539_v39 = vld [vmem:[%s1359_s4] sm:$0xff]  ;;  %s371_s13 = scalar_lea.vmem [#allocation9], %s834_s12 }
  0x47   : > { %vm512_vm8 = vcmp.ge.s32.totalorder %v510_v21, 0  ;;  %s721_s26 = sshll.u32 %s371_s13, 4  ;;  %s722_s26 = int_to_ptr.vmem [resolvable:$true] %s721_s26 }
  0x48   : > { %s1003_s9 = scalar_lea.vmem %s722_s26, 128  ;;  %p1010_p2 = scmp.lt.s32.totalorder %s722_s26, %s1008_s17 }
  0x49   : > { %p1004_p1 = scmp.ne.s32.totalorder %s722_s26, %s1003_s9 }
  0x4a   : > { %385 = vrot.lane.b32.xlu0 %v380_v1, %s1098_s19  ;;  %424 = vperm.xlu1 %947, %v421_v3  }
  0x4b   : > { %p1005_p13 = pnand %p1004_p1, %p1231_p0 }
  0x4d   : > { %p1006_p11 = pneg %p1005_p13 }
  0xb2   : > { %v405_v5 = vpop.permute.xlu0 %404 }
  0xb3   : > { %v394_v6 = vpop.permute.xlu1 %393  ;;  %407 = vst.msk [vmem:[#allocation2 + $0x20] sm:$0xff] %vm390_vm2, %v405_v5 }
  0xb4   : > { %397 = vst.msk [vmem:[#allocation2 + $0x10] sm:$0xff] %vm396_vm3, %v394_v6 }
  0xb8   : > { %v409_v7 = vpop.permute.xlu0 %408  ;;  %v399_v8 = vpop.permute.xlu1 %398 }
  0xb9   : > { %412 = vst.msk [vmem:[#allocation2 + $0x20] sm:$0xff] %vm411_vm4, %v409_v7 }
  0xba   : > { %413 = vst.msk [vmem:[#allocation2 + $0x28] sm:$0xff] %vm390_vm2, %v409_v7  ;;  %403 = vst.msk [vmem:[#allocation2 + $0x18] sm:$0xff] %vm390_vm2, %v399_v8 }
  0xbb   : > { %402 = vst.msk [vmem:[#allocation2 + $0x10] sm:$0xff] %vm401_vm5, %v399_v8 }
  0xbc   : > { %v386_v9 = vpop.permute.xlu0 %385 }
  0xbd   : > { %389 = vst.msk [vmem:[#allocation2] sm:$0xff] %vm388_vm6, %v386_v9 }
  0xbe   : > { %391 = vst.msk [vmem:[#allocation2 + $0x8] sm:$0xff] %vm390_vm2, %v386_v9 }
  0xc0   : > { %v419_v11 = vld [vmem:[#allocation2 + $0x20] sm:$0xff] }
  0xc1   : > { %v420_v10 = vld [vmem:[#allocation2 + $0x28] sm:$0xff]  ;;  %v418_v12 = vld [vmem:[#allocation2 + $0x18] sm:$0xff] }
  0xc2   : > { %457 = vmatprep.subr.mxu0 %v420_v10  ;;  %v417_v13 = vld [vmem:[#allocation2 + $0x10] sm:$0xff] }
  0xc3   : > { %458 = vmatpush1.msra.mxu0 %v419_v11 }
  0xc4   : > { %459 = vmatprep.subr.mxu0 %v418_v12  ;;  %v415_v15 = vld [vmem:[#allocation2] sm:$0xff] }
  0xc5   : > { %460 = vmatpush1.msra.mxu0 %v417_v13  ;;  %v416_v14 = vld [vmem:[#allocation2 + $0x8] sm:$0xff]  ;;  %v425_v20 = vpop.permute.xlu1 %424 }
  0xc6   : > { %461 = vmatprep.subr.mxu0 %v416_v14 }
  0xc7   : > { %462 = vmatpush1.msra.mxu0 %v415_v15 }
  0xc8   : > { %838 = vmatmul.mubr.msk.f32.vlgmr.msra.gmra.mxu0 %vm427_vm7, %v414_v16  ;;  %861 = vmatprep.subr.mxu0 %v1095_v2 }
  0xc9   : > { %862 = vmatpush3.msra.mxu0 %v380_v1  ;;  %863 = vmatprep.mubr.msk.f32.mxu0 %vm1097_vm1, %v1095_v2 }
  0xcc   : > { %864 = vmatmul.mubr.msk.f32.vlgmr.msra.gmra.mxu0 %vm382_vm0, %v623_v17 }
 0x188   : > { %v497_v22 = vpop.f32.mrf.mxu0 }
 0x189   : > { %v498_v23 = vadd.f32 %v497_v22, %v425_v20 }
 0x18a   : > { %v499_v24 = vpop.f32.mrf.mxu0 }
 0x18b   : > { %v502_v25 = vmax.f32 %v498_v23, 0.0  ;;  %v500_v26 = vadd.f32 %v499_v24, %v425_v20 }
 0x18c   : > { %v699_v27 = vpop.f32.mrf.mxu0 }
 0x18d   : > { %v503_v28 = vmax.f32 %v500_v26, 0.0  ;;  %v518_v29 = vsel %vm512_vm8, %v502_v25, 0.0 }
 0x18e   : > { %531 = vrot.lane.b32.xlu0 %v518_v29, %s1091_s25  ;;  %v865_v30 = vpop.f32.mrf.mxu0 }
 0x18f   : > { %533 = vrot.lane.b32.xlu1 %v503_v28, %s1091_s25 }
 0x192   : > { %523 = vrot.lane.b32.xlu0 %v518_v29, %s1092_s15 }
 0x193   : > { %525 = vrot.lane.b32.xlu1 %v503_v28, %s1092_s15  ;;  %s842_s15 = sshll.u32 %s1079_s30, 7  ;;  %s1009_s30 = scalar_lea.vmem %s1008_s17, 256 }
 0x194   : > { %s719_s19 = scalar_lea.hbm %s1363_s8, %s842_s15  ;;  %p1011_p12 = scmp.lt.s32.totalorder %s1009_s30, %s1003_s9 }
 0x196   : > { %546 = vperm.xlu0 %948, %v543_v31   ;;  %p1012_p3 = por %p1011_p12, %p1010_p2 }
 0x197   : > { %627 = vperm.xlu1 %947, %v624_v32  }
 0x198   : > { %p1013_p5 = pnand %p1012_p3, %p1006_p11 }
 0x200   : > { %v532_v33 = vpop.permute.xlu0 %531 }
 0x201   : > { %v534_v34 = vpop.permute.xlu1 %533 }
 0x202   : > { %v536_v35 = vsel %vm535_vm9, %v532_v33, %v534_v34 }
 0x203   : > { %853 = vmatpush3.msra.mxu1 %v536_v35 }
 0x204   : > { %v524_v36 = vpop.permute.xlu0 %523  ;;  %854 = vmatprep.subr.mxu1 %v1095_v2 }
 0x205   : > { %v526_v37 = vpop.permute.xlu1 %525 }
 0x206   : > { %v528_v38 = vsel %vm527_vm10, %v524_v36, %v526_v37 }
 0x207   : > { %855 = vmatpush3.msra.mxu1 %v528_v38 }
 0x208   : > { %856 = vmatprep.subr.mxu1 %v1095_v2 }
 0x209   : > { %857 = vmatpush3.msk.msra.mxu1 %vm512_vm8, %v502_v25 }
 0x20a   : > { %859 = vmatmul.mubr.msk.f32.vlgmr.msra.gmra.mxu1 %vm427_vm7, %v539_v39 }
 0x211   : > { %v547_v40 = vpop.permute.xlu0 %546 }
 0x212   : > { %v628_v41 = vpop.permute.xlu1 %627 }
 0x213   : > { %v700_v45 = vadd.f32 %v699_v27, %v628_v41 }
 0x2ca   : > { %v618_v42 = vpop.f32.mrf.mxu1 }
 0x2cb   : > { %v619_v43 = vadd.f32 %v618_v42, %v547_v40 }
 0x2cc   : > { %v860_v44 = vpop.f32.mrf.mxu1 }
 0x2cd   : > { %v622_v46 = vmax.f32 %v619_v43, 0.0 }
 0x2cf   : > { %v703_v47 = vadd.f32 %v700_v45, %v622_v46 }
 0x2d1   : > { %v704_v48 = vmax.f32 %v703_v47, 0.0 }
 0x2d3   : > { %705 = vst [vmem:[%s371_s13] sm:$0xff] %v704_v48 }
 0x2d4   : > { %1016 = shalt.err (!%p1013_p5)
}
 0x2d5   : > { %s1017_s12 = scalar_lea.hbm %s719_s19, 128  ;;  %s1021_s23 = scalar_lea.hbm %s1363_s8, 256 }
 0x2d6   : > { %p1018_p7 = scmp.ne.s32.totalorder %s719_s19, %s1017_s12  ;;  %p1022_p10 = scmp.lt.s32.totalorder %s719_s19, %s1363_s8 }
 0x2d7   : > { %p1023_p9 = scmp.lt.s32.totalorder %s1021_s23, %s1017_s12 }
 0x2d8   : > { %p1019_p6 = pnand %p1018_p7, %p1231_p0 }
 0x2d9   : > { %p1024_p8 = por %p1023_p9, %p1022_p10 }
 0x2da   : > { %p1020_p4 = pneg %p1019_p6 }
 0x2dc   : > { %p1025_p1 = pnand %p1024_p8, %p1020_p4 }
 0x2de   : > { %1028 = shalt.err (!%p1025_p1)
}
 0x2df   : > { %872 = dma.vmem_to_hbm [thread:$0]  (%p1231_p0), %s722_s26, 128, %s719_s19, %s707_s20  }
 0x2e0 PF: > { %s1382_s15 = sld [smem:[#allocation14_spill]]  ;;  %s733_s13 = sand.u32 1, %s1067_s27  }
 0x2e1   : > { %p1384_p11 = scmp.ge.s32.totalorder %s1087_s10, 2  ;;  %s734_s14 = scalar_lea.sflag [#allocation6], %s733_s13 }
 0x2e6   : > { %p1383_p13 = scmp.ne.s32.totalorder %s1382_s15, 0 }
 0x2e8   : > { %p883_p2 = pnand %p1384_p11, %p1383_p13 }
 0x2ea   : > { %p884_p12 = pneg %p883_p2 }
 0x2ec   : > { %1062 = dma.done.wait (%p884_p12), %s734_s14, 128  }
 0x2ed   : > { %1064 = vsyncadd (%p884_p12), %s734_s14, 4294967168  ;;  %s25_s10 = sadd.s32 1, %s1087_s10   ;;  %s1385_s30 = sld [smem:[#allocation13_spill]] }
 0x2ee   : > { %p22_p3 = scmp.ge.s32.totalorder %s25_s10, 4   ;;  %s1386_s9 = sld [smem:[#allocation15_spill]] }
 0x2ef   : > { %s1387_s27 = smov %s1071_s28  ;;  %s1388_s28 = smov %s1075_s29 }
 0x2f0   : > { %s1389_s29 = smov %s1237_s18  ;;  %24 = sbr.rel (!%p22_p3) target bundleno = 9 (0x9), region = 104 }
 0x2f5   :  { %739 = vsyncpa [#allocation5], 1 }
 0x2f6   :  { %741 = vsyncpa [#allocation5 + $0x1], 1 }
 0x2f7   :  { %742 = vsyncpa [#allocation8], 1 }
 0x2f8   :  { %743 = vsyncpa [#allocation6], 1 }
 0x2f9   :  { %745 = vsyncpa [#allocation6 + $0x1], 1 }

</bundles_post_ra>
